<compile_context>
chip_gen: v7x
topology: tpu7x:2x2x1
jax: 0.10.0
libtpu: 0.0.40
codegen_flags: <defaults>
</compile_context>

<pallas_src>
import functools
import math

import jax
import jax.numpy as jnp
from jax import lax
from jax.experimental import pallas as pl
from jax.experimental.pallas import tpu as pltpu


def _round_up(x, m):
    return ((x + m - 1) // m) * m


def _bernoulli_encoder_kernel(x_ref, coef_ref, out_ref, *, n_clusters, pack):
    # x_ref:    (tbp, pack)   packed inputs; `pack` batch rows per output row
    # coef_ref: (8, pack*N)   rows 0..2 = quadratic coefficients a, b, c
    #                         (padded to 8 sublanes for (8,128) alignment)
    # out_ref:  (tbp, pack*N) lane-dense output slab
    tbp = x_ref.shape[0]
    kn = out_ref.shape[-1]

    a = coef_ref[0:1, :]               # (1, kn) -> sublane-broadcast in FMAs
    b = coef_ref[1:2, :]
    c = coef_ref[2:3, :]

    x = x_ref[...]                     # (tbp, pack)

    if pack == 1:
        xb = jnp.broadcast_to(x[:, 0:1], (tbp, kn))
    else:
        # xb[r, l] = x[r, l // N].  The iota and compare masks are built at
        # (1, kn) (loop-invariant, constant-foldable), so per-tile VALU work is
        # only the (pack-1) selects plus the lane broadcasts of the x columns.
        lane = lax.broadcasted_iota(jnp.int32, (1, kn), 1)
        xb = jnp.broadcast_to(x[:, pack - 1:pack], (tbp, kn))
        for k in range(pack - 2, -1, -1):
            mask = lane < (k + 1) * n_clusters          # (1, kn) constant mask
            xk = jnp.broadcast_to(x[:, k:k + 1], (tbp, kn))
            xb = jnp.where(mask, xk, xb)

    # Quadratic in Horner form: two FMAs per output element (pure VPU work; the
    # K=1 contraction of the reference is deliberately NOT routed to the MXU).
    out_ref[...] = (a * xb + b) * xb + c


def bernoulli_encoder_forward(x, cs, log_sigmas, As, *, block_rows=2048,
                              vmem_limit_bytes=None):
    """Pallas forward for BernoulliEncoder.

    x: (B, 1) float32; cs/log_sigmas/As: (1, N) float32. Returns (B, N) float32.
    """
    B, D = x.shape
    assert D == 1, "BernoulliEncoder assumes scalar inputs (feature dim = 1)"
    _, N = cs.shape

    # ---- Hoisted, loop-invariant parameter math (computed once, not per tile).
    inv_sigmas = 0.5 * jnp.exp(-2.0 * log_sigmas)            # (1, N)
    coef_a = -inv_sigmas                                     # x^2 coefficient
    coef_b = 2.0 * cs * inv_sigmas                           # x coefficient
    coef_c = -(cs * cs) * inv_sigmas + jnp.log(As)           # constant term

    # ---- Lane packing: fold `pack` batch rows per 128-lane-multiple output row.
    pack = 128 // math.gcd(N, 128)
    if pack > 32:
        # TODO(synk): tiny/odd N (pack > 32) should use an MXU block-diagonal
        # expansion instead of a long select chain; fall back to unpacked layout.
        pack = 1
    kn = pack * N

    coef = jnp.concatenate([coef_a, coef_b, coef_c], axis=0)      # (3, N)
    coef = jnp.tile(coef, (1, pack)).astype(jnp.float32)          # (3, kn)
    coef = jnp.concatenate(                                       # (8, kn)
        [coef, jnp.zeros((5, kn), jnp.float32)], axis=0)

    # ---- Batch packing + tile selection.
    xf = x.reshape(B).astype(jnp.float32)
    rows = -(-B // pack)                                          # cdiv(B, pack)

    # Cap the row tile so (a) the output block stays ~<= 2 MiB of VMEM and
    # (b) the grid has >= 2 steps (v7x megacore shards the "parallel" axis).
    max_tile_elems = (2 * 1024 * 1024) // 4
    row_cap = max(8, ((max_tile_elems // kn) // 8) * 8)
    tcap = max(8, min(block_rows, row_cap, _round_up((rows + 1) // 2, 8)))
    tcap = _round_up(tcap, 8)

    # Prefer a tile that divides `rows` exactly: no padded rows -> no epilogue
    # slice copy (which would double HBM traffic for this write-bound kernel).
    tbp = tcap
    t = tcap
    lo = max(8, tcap // 4)
    while t >= lo:
        if rows % t == 0:
            tbp = t
            break
        t -= 8

    rows_p = _round_up(rows, tbp)
    bp = rows_p * pack
    if bp != B:
        xf = jnp.pad(xf, (0, bp - B))
    x_packed = xf.reshape(rows_p, pack)
    grid = (rows_p // tbp,)

    # VMEM budget: the (tbp, pack) x tile is lane-padded to 128 in VMEM, so it
    # costs as much as a 128-lane tile. Only override the scoped default when
    # the double-buffered working set would exceed it.
    if vmem_limit_bytes is None:
        est = 2 * tbp * 4 * (max(pack, 128) + kn) + 8 * kn * 4
        if est > 12 * 1024 * 1024:
            vmem_limit_bytes = min(int(est * 1.5) + (1 << 20), 60 * 1024 * 1024)

    kernel = functools.partial(_bernoulli_encoder_kernel,
                               n_clusters=N, pack=pack)

    out_packed = pl.pallas_call(
        kernel,
        out_shape=jax.ShapeDtypeStruct((rows_p, kn), jnp.float32),
        grid_spec=pltpu.PrefetchScalarGridSpec(
            num_scalar_prefetch=0,
            grid=grid,
            in_specs=[
                pl.BlockSpec((tbp, pack), lambda i: (i, 0)),   # packed x tile
                pl.BlockSpec((8, kn), lambda i: (0, 0)),       # resident coefs
            ],
            out_specs=pl.BlockSpec((tbp, kn), lambda i: (i, 0)),
        ),
        compiler_params=pltpu.CompilerParams(
            dimension_semantics=("parallel",),
            vmem_limit_bytes=vmem_limit_bytes,
        ),
    )(x_packed, coef)

    out = out_packed.reshape(rows_p * pack, N)   # free row-major reshape
    if bp != B:
        out = out[:B]    # only pays the slice copy for ragged batch sizes
    return out


def init_bernoulli_params(N, x_min, x_max, w=1.0):
    # Deterministic stand-in for the KMeans-based init: evenly spaced centers.
    # TODO(synk): sklearn KMeans init has no Pallas/JAX equivalent; centers are
    # deterministic linspace instead of fitted cluster centers.
    centers = jnp.linspace(x_min, x_max, N, dtype=jnp.float32)   # sorted
    cs = centers[None, :]                                        # (1, N)
    deltac = jnp.diff(centers)                                   # (N-1,)
    deltac = jnp.concatenate([deltac, deltac[-1:]])              # (N,)
    log_sigmas = jnp.log(jnp.sqrt(w * deltac))[None, :]          # (1, N)
    As = jnp.ones((1, N), dtype=jnp.float32)
    return cs, log_sigmas, As


def reference_forward(x, cs, log_sigmas, As):
    inv_sigmas = 0.5 * jnp.exp(-2.0 * log_sigmas)
    etas1 = -(x ** 2) @ inv_sigmas
    etas2 = 2.0 * x @ (cs * inv_sigmas)
    etas3 = -(cs ** 2) * inv_sigmas + jnp.log(As)
    return etas1 + etas2 + etas3


if __name__ == "__main__":
    N = 32
    x_min, x_max = -2.0, 2.0
    cs, log_sigmas, As = init_bernoulli_params(N, x_min, x_max, w=1.0)

    key = jax.random.PRNGKey(0)

    # Main case: 2048 rows -> 512 packed rows -> grid of 2 (pipelining +
    # megacore sharding on v7x), no padding, no epilogue slice.
    B = 2048
    x = jax.random.uniform(key, (B, 1), dtype=jnp.float32,
                           minval=x_min, maxval=x_max)
    out = jax.block_until_ready(bernoulli_encoder_forward(x, cs, log_sigmas, As))
    ref = reference_forward(x, cs, log_sigmas, As)
    assert out.shape == (B, N)
    assert jnp.allclose(out, ref, atol=1e-4, rtol=1e-5)

    # Larger batch: exercises the full-size (~1 MiB) output tile path.
    B3 = 16384
    x3 = jax.random.uniform(jax.random.PRNGKey(2), (B3, 1), dtype=jnp.float32,
                            minval=x_min, maxval=x_max)
    out3 = jax.block_until_ready(
        bernoulli_encoder_forward(x3, cs, log_sigmas, As))
    ref3 = reference_forward(x3, cs, log_sigmas, As)
    assert out3.shape == (B3, N)
    assert jnp.allclose(out3, ref3, atol=1e-4, rtol=1e-5)

    # Ragged small batch: exercises the padding / slice path.
    B2 = 100
    x2 = jax.random.uniform(jax.random.PRNGKey(1), (B2, 1), dtype=jnp.float32,
                            minval=x_min, maxval=x_max)
    out2 = jax.block_until_ready(
        bernoulli_encoder_forward(x2, cs, log_sigmas, As))
    ref2 = reference_forward(x2, cs, log_sigmas, As)
    assert out2.shape == (B2, N)
    assert jnp.allclose(out2, ref2, atol=1e-4, rtol=1e-5)

    print("KERNEL_OK")
</pallas_src>

<mosaic_0001>
module attributes {stable_mosaic.version = 11 : i64} {
  func.func @_bernoulli_encoder_kernel(%arg0: i32, %arg1: memref<256x4xf32, #tpu.memory_space<vmem>>, %arg2: memref<8x128xf32, #tpu.memory_space<vmem>>, %arg3: memref<256x128xf32, #tpu.memory_space<vmem>>) attributes {dimension_semantics = [#tpu.dimension_semantics<parallel>], iteration_bounds = array<i64: 2>, scalar_prefetch = 0 : i64, scratch_operands = 0 : i64, tpu.core_type = #tpu.core_type<tc>, window_params = [{transform_indices = @transform_0, window_bounds = array<i64: 256, 4>}, {pipeline_mode = #tpu.pipeline_mode<synchronous>, transform_indices = @transform_1, window_bounds = array<i64: 8, 128>}, {transform_indices = @transform_2, window_bounds = array<i64: 256, 128>}]} {
    %c0 = arith.constant 0 : index
    %c0_0 = arith.constant 0 : index
    %0 = vector.load %arg2[%c0, %c0_0] : memref<8x128xf32, #tpu.memory_space<vmem>>, vector<1x128xf32>
    %c1 = arith.constant 1 : index
    %c0_1 = arith.constant 0 : index
    %1 = vector.load %arg2[%c1, %c0_1] : memref<8x128xf32, #tpu.memory_space<vmem>>, vector<1x128xf32>
    %c2 = arith.constant 2 : index
    %c0_2 = arith.constant 0 : index
    %2 = vector.load %arg2[%c2, %c0_2] : memref<8x128xf32, #tpu.memory_space<vmem>>, vector<1x128xf32>
    %c0_3 = arith.constant 0 : index
    %c0_4 = arith.constant 0 : index
    %3 = vector.load %arg1[%c0_3, %c0_4] : memref<256x4xf32, #tpu.memory_space<vmem>>, vector<256x4xf32>
    %4 = tpu.iota {dimensions = array<i32: 1>} : vector<1x128xi32>
    %5 = vector.extract_strided_slice %3 {offsets = [0, 3], sizes = [256, 1], strides = [1, 1]} : vector<256x4xf32> to vector<256x1xf32>
    %6 = vector.shape_cast %5 : vector<256x1xf32> to vector<256x1xf32>
    %7 = vector.broadcast %6 : vector<256x1xf32> to vector<256x128xf32>
    %c96_i32 = arith.constant 96 : i32
    %8 = vector.broadcast %c96_i32 : i32 to vector<1x128xi32>
    %9 = arith.cmpi slt, %4, %8 : vector<1x128xi32>
    %10 = vector.extract_strided_slice %3 {offsets = [0, 2], sizes = [256, 1], strides = [1, 1]} : vector<256x4xf32> to vector<256x1xf32>
    %11 = vector.shape_cast %10 : vector<256x1xf32> to vector<256x1xf32>
    %12 = vector.broadcast %11 : vector<256x1xf32> to vector<256x128xf32>
    %13 = vector.shape_cast %9 : vector<1x128xi1> to vector<1x128xi1>
    %14 = vector.broadcast %13 : vector<1x128xi1> to vector<256x128xi1>
    %15 = arith.select %14, %12, %7 : vector<256x128xi1>, vector<256x128xf32>
    %c64_i32 = arith.constant 64 : i32
    %16 = vector.broadcast %c64_i32 : i32 to vector<1x128xi32>
    %17 = arith.cmpi slt, %4, %16 : vector<1x128xi32>
    %18 = vector.extract_strided_slice %3 {offsets = [0, 1], sizes = [256, 1], strides = [1, 1]} : vector<256x4xf32> to vector<256x1xf32>
    %19 = vector.shape_cast %18 : vector<256x1xf32> to vector<256x1xf32>
    %20 = vector.broadcast %19 : vector<256x1xf32> to vector<256x128xf32>
    %21 = vector.shape_cast %17 : vector<1x128xi1> to vector<1x128xi1>
    %22 = vector.broadcast %21 : vector<1x128xi1> to vector<256x128xi1>
    %23 = arith.select %22, %20, %15 : vector<256x128xi1>, vector<256x128xf32>
    %c32_i32 = arith.constant 32 : i32
    %24 = vector.broadcast %c32_i32 : i32 to vector<1x128xi32>
    %25 = arith.cmpi slt, %4, %24 : vector<1x128xi32>
    %26 = vector.extract_strided_slice %3 {offsets = [0, 0], sizes = [256, 1], strides = [1, 1]} : vector<256x4xf32> to vector<256x1xf32>
    %27 = vector.shape_cast %26 : vector<256x1xf32> to vector<256x1xf32>
    %28 = vector.broadcast %27 : vector<256x1xf32> to vector<256x128xf32>
    %29 = vector.shape_cast %25 : vector<1x128xi1> to vector<1x128xi1>
    %30 = vector.broadcast %29 : vector<1x128xi1> to vector<256x128xi1>
    %31 = arith.select %30, %28, %23 : vector<256x128xi1>, vector<256x128xf32>
    %32 = vector.broadcast %0 : vector<1x128xf32> to vector<256x128xf32>
    %33 = arith.mulf %32, %31 : vector<256x128xf32>
    %34 = vector.broadcast %1 : vector<1x128xf32> to vector<256x128xf32>
    %35 = arith.addf %33, %34 : vector<256x128xf32>
    %36 = arith.mulf %35, %31 : vector<256x128xf32>
    %37 = vector.broadcast %2 : vector<1x128xf32> to vector<256x128xf32>
    %38 = arith.addf %36, %37 : vector<256x128xf32>
    %c0_5 = arith.constant 0 : index
    %c0_6 = arith.constant 0 : index
    %39 = vector.load %arg3[%c0_5, %c0_6] : memref<256x128xf32, #tpu.memory_space<vmem>>, vector<256x128xf32>
    tpu.vector_store %arg3[%c0_5, %c0_6], %38 {strides = array<i32>} : memref<256x128xf32, #tpu.memory_space<vmem>>, vector<256x128xf32>,
    return
  }
  func.func @transform_0(%arg0: i32) -> (i32, i32) {
    %c0_i32 = arith.constant 0 : i32
    %c0_i32_0 = arith.constant 0 : i32
    return %arg0, %c0_i32 : i32, i32
  }
  func.func @transform_1(%arg0: i32) -> (i32, i32) {
    %c0_i32 = arith.constant 0 : i32
    %c0_i32_0 = arith.constant 0 : i32
    %c0_i32_1 = arith.constant 0 : i32
    return %c0_i32, %c0_i32_0 : i32, i32
  }
  func.func @transform_2(%arg0: i32) -> (i32, i32) {
    %c0_i32 = arith.constant 0 : i32
    %c0_i32_0 = arith.constant 0 : i32
    return %arg0, %c0_i32 : i32, i32
  }
}

</mosaic_0001>

<bundles_post_ra>
// kernel: tpu_custom_call.1
= control target key start
LH: loop header
LB: loop body
LE: loop exit
PB: predicated region body
PF: predicated region fallthrough
CT: control target
= control target key end

     0   :  { %7 = vsyncpa [#allocation3], 0  ;;  %s2194_s0 = inlined_call_operand.vmem [shape: f32[512,4], index: 0, kind: input, shape index: {}]   ;;  %s2195_s1 = inlined_call_operand.vmem [shape: f32[8,128], index: 1, kind: input, shape index: {}]   ;;  %s2196_s2 = inlined_call_operand.hbm [shape: f32[512,128], index: 2, kind: output, shape index: {}]  }
   0x1   :  { %9 = vsyncpa [#allocation3 + $0x1], 0  ;;  %s1234_s9 = smov 0   ;;  %s1236_s10 = smov 0  }
   0x2   :  { %s1238_s11 = smov 0   ;;  %s1240_s12 = smov 0  }
   0x3 LB: > { %s1255_s13 = sadd.s32 4294967295, %s1210_s12   ;;  %s1079_s14 = sadd.s32 4294967294, %s1210_s12   ;;  %s1210_s12 = sphi %s1240_s12, %s2224_s12   ;;  %s1206_s11 = sphi %s1238_s11, %s2223_s11   ;;  %s1202_s10 = sphi %s1236_s10, %s2222_s10   ;;  %s1198_s9 = sphi %s1234_s9, %s2221_s9  }
   0x4   : > { %s1259_s15 = sadd.s32 1, %s1210_s12   ;;  %s69_s16 = sadd.s32 1, %s1206_s11 }
   0x5   : > { %s66_s17 = ssub.s32 %s1210_s12, %s1259_s15  ;;  %p79_p0 = scmp.ne.s32.totalorder %s1206_s11, %s1202_s10 }
   0x6   : > { %p67_p1 = scmp.eq.s32.totalorder %s66_s17, 0  ;;  %p80_p2 = scmp.eq.s32.totalorder %s1255_s13, 1 }
   0x7   : > { %p85_p3 = scmp.ne.s32.totalorder %s1202_s10, %s1198_s9  ;;  %p86_p4 = scmp.eq.s32.totalorder %s1079_s14, 1 }
   0x8   : > { %s1270_s18 = scalar_select %p67_p1, %s1206_s11, %s69_s16  }
   0x9   : > { %p1272_p5 = por %p80_p2, %p79_p0  ;;  %p1276_p6 = por %p86_p4, %p85_p3 }
   0xa   : > { %p1082_p7 = scmp.ge.s32.totalorder %s1210_s12, 1  ;;  %p116_p8 = scmp.lt.s32.totalorder %s1210_s12, 3 }
   0xc   : > { %p117_p9 = pnand %p1082_p7, %p116_p8 }
   0xe   : > { %120 = sbr.rel (%p117_p9) target bundleno = 439 (0x1b7), region = 28 }
  0x15   : > { %s1084_s21 = sshll.u32 %s1255_s13, 5  ;;  %v1212_v0 = vmov 3   ;;  %v1213_v33 = vmov 2   ;;  %v1214_v36 = vmov 1   ;;  %s135_s30 = sand.u32 1, %s1202_s10  }
  0x16   : > { %1141 = vset.pattern.permute.xlu1 %v1212_v0  ;;  %1140 = vset.pattern.permute.xlu0 %v1212_v0  ;;  %p139_p10 = scmp.lt.s32.totalorder %s1084_s21, 63  ;;  %s1083_s3 = sshll.u32 %s135_s30, 8 }
  0x17   : > { %s1855_s6 = scalar_lea.vmem [#allocation2], %s1083_s3  ;;  %s1094_s7 = sshll.u32 %s1255_s13, 12 }
  0x18   : > { %s2226_s21 = smov (!%p139_p10, %s1084_s21), 63  ;;  %s1017_s8 = sshll.u32 %s1855_s6, 4  ;;  %s2147_s8 = int_to_ptr.vmem [resolvable:$true] %s1017_s8 }
  0x19   : > { %s1085_s22 = sshll.u32 %s2226_s21, 3  ;;  %s2145_s17 = scalar_lea.hbm %s2196_s2, %s1094_s7 }
  0x1a   : > { %s1286_s25 = scalar_lea.vmem %s2194_s0, %s1085_s22  ;;  %s2153_s21 = scalar_lea.sflag [#allocation3], %s135_s30 }
  0x1b   : > { %v1289_v1 = vld [vmem:[%s1286_s25 + $0x10] sm:$0xff]  ;;  %v1292_v2 = vld [vmem:[%s1286_s25] sm:$0xff]  ;;  %v1297_v3 = vld [vmem:[%s1286_s25 + $0x18] sm:$0xff]  ;;  %s1148_s13 = scalar_lea.vmem %s2147_s8, 4096  ;;  %s1216_s22 = smov [#allocation2]  }
  0x1c   : > { %194 = vperm.xlu1 %1141, %v1289_v1   ;;  %184 = vperm.xlu0 %1140, %v1292_v2   ;;  %v1300_v4 = vld [vmem:[%s1286_s25 + $0x8] sm:$0xff]  ;;  %v1308_v6 = vld [vmem:[%s1286_s25 + $0x20] sm:$0xff]  ;;  %v1313_v7 = vld [vmem:[%s1286_s25 + $0x38] sm:$0xff]  ;;  %p1149_p11 = scmp.ne.s32.totalorder %s2147_s8, %s1148_s13  ;;  %s1152_s23 = sshll.u32 %s1216_s22, 4  ;;  %s1153_s23 = int_to_ptr.vmem [resolvable:$false] %s1152_s23 }
  0x1d   : > { %v1305_v5 = vld [vmem:[%s1286_s25 + $0x28] sm:$0xff]  ;;  %v1316_v8 = vld [vmem:[%s1286_s25 + $0x30] sm:$0xff]  ;;  %v1324_v10 = vld [vmem:[%s1286_s25 + $0x40] sm:$0xff]  ;;  %s1154_s24 = scalar_lea.vmem %s1153_s23, 8192  ;;  %p1155_p0 = scmp.lt.s32.totalorder %s2147_s8, %s1153_s23 }
  0x1e   : > { %v1321_v9 = vld [vmem:[%s1286_s25 + $0x48] sm:$0xff]  ;;  %v1329_v11 = vld [vmem:[%s1286_s25 + $0x58] sm:$0xff]  ;;  %v1332_v12 = vld [vmem:[%s1286_s25 + $0x50] sm:$0xff]  ;;  %p1150_p12 = pnand %p1149_p11, %p1272_p5  ;;  %p1156_p1 = scmp.lt.s32.totalorder %s1154_s24, %s1148_s13 }
  0x1f   : > { %v1337_v13 = vld [vmem:[%s1286_s25 + $0x68] sm:$0xff]  ;;  %v1340_v14 = vld [vmem:[%s1286_s25 + $0x60] sm:$0xff]  ;;  %v1345_v15 = vld [vmem:[%s1286_s25 + $0x78] sm:$0xff] }
  0x20   : > { %199 = vperm.xlu1 %1141, %v1297_v3   ;;  %189 = vperm.xlu0 %1140, %v1300_v4   ;;  %v1348_v16 = vld [vmem:[%s1286_s25 + $0x70] sm:$0xff]  ;;  %v1353_v17 = vld [vmem:[%s1286_s25 + $0x88] sm:$0xff]  ;;  %v1356_v18 = vld [vmem:[%s1286_s25 + $0x80] sm:$0xff]  ;;  %p1151_p13 = pneg %p1150_p12  ;;  %p1157_p2 = por %p1156_p1, %p1155_p0 }
  0x21   : > { %v1361_v19 = vld [vmem:[%s1286_s25 + $0x98] sm:$0xff]  ;;  %v1364_v20 = vld [vmem:[%s1286_s25 + $0x90] sm:$0xff]  ;;  %v1369_v21 = vld [vmem:[%s1286_s25 + $0xa8] sm:$0xff] }
  0x22   : > { %v1372_v22 = vld [vmem:[%s1286_s25 + $0xa0] sm:$0xff]  ;;  %v1377_v23 = vld [vmem:[%s1286_s25 + $0xb8] sm:$0xff]  ;;  %v1380_v24 = vld [vmem:[%s1286_s25 + $0xb0] sm:$0xff]  ;;  %p1158_p3 = pnand %p1157_p2, %p1151_p13 }
  0x23   : > { %v1385_v25 = vld [vmem:[%s1286_s25 + $0xc8] sm:$0xff]  ;;  %v1388_v26 = vld [vmem:[%s1286_s25 + $0xc0] sm:$0xff]  ;;  %v1393_v27 = vld [vmem:[%s1286_s25 + $0xd8] sm:$0xff] }
  0x24   : > { %209 = vperm.xlu1 %1141, %v1305_v5   ;;  %204 = vperm.xlu0 %1140, %v1308_v6   ;;  %v1396_v28 = vld [vmem:[%s1286_s25 + $0xd0] sm:$0xff]  ;;  %v1401_v29 = vld [vmem:[%s1286_s25 + $0xe8] sm:$0xff]  ;;  %v1404_v30 = vld [vmem:[%s1286_s25 + $0xe0] sm:$0xff] }
  0x25   : > { %v1409_v31 = vld [vmem:[%s1286_s25 + $0xf8] sm:$0xff]  ;;  %v1412_v32 = vld [vmem:[%s1286_s25 + $0xf0] sm:$0xff] }
  0x28   : > { %219 = vperm.xlu1 %1141, %v1313_v7   ;;  %214 = vperm.xlu0 %1140, %v1316_v8  }
  0x2c   : > { %229 = vperm.xlu1 %1141, %v1321_v9   ;;  %224 = vperm.xlu0 %1140, %v1324_v10  }
  0x30   : > { %239 = vperm.xlu1 %1141, %v1329_v11   ;;  %234 = vperm.xlu0 %1140, %v1332_v12  }
  0x34   : > { %249 = vperm.xlu1 %1141, %v1337_v13   ;;  %244 = vperm.xlu0 %1140, %v1340_v14  }
  0x38   : > { %259 = vperm.xlu1 %1141, %v1345_v15   ;;  %254 = vperm.xlu0 %1140, %v1348_v16  }
  0x3c   : > { %269 = vperm.xlu1 %1141, %v1353_v17   ;;  %264 = vperm.xlu0 %1140, %v1356_v18  }
  0x40   : > { %279 = vperm.xlu1 %1141, %v1361_v19   ;;  %274 = vperm.xlu0 %1140, %v1364_v20  }
  0x44   : > { %289 = vperm.xlu1 %1141, %v1369_v21   ;;  %284 = vperm.xlu0 %1140, %v1372_v22  }
  0x48   : > { %299 = vperm.xlu1 %1141, %v1377_v23   ;;  %294 = vperm.xlu0 %1140, %v1380_v24  }
  0x4c   : > { %309 = vperm.xlu1 %1141, %v1385_v25   ;;  %304 = vperm.xlu0 %1140, %v1388_v26  }
  0x50   : > { %319 = vperm.xlu1 %1141, %v1393_v27   ;;  %314 = vperm.xlu0 %1140, %v1396_v28  }
  0x54   : > { %329 = vperm.xlu1 %1141, %v1401_v29   ;;  %324 = vperm.xlu0 %1140, %v1404_v30  }
  0x58   : > { %339 = vperm.xlu1 %1141, %v1409_v31   ;;  %334 = vperm.xlu0 %1140, %v1412_v32  }
  0x5c   : > { %1143 = vset.pattern.permute.xlu1 %v1213_v33  ;;  %1142 = vset.pattern.permute.xlu0 %v1213_v33 }
  0x5d   : > { %348 = vperm.xlu1 %1143, %v1300_v4   ;;  %344 = vperm.xlu0 %1142, %v1292_v2  }
  0x61   : > { %352 = vperm.xlu1 %1143, %v1289_v1   ;;  %356 = vperm.xlu0 %1142, %v1297_v3  }
  0x65   : > { %360 = vperm.xlu1 %1143, %v1308_v6   ;;  %364 = vperm.xlu0 %1142, %v1305_v5  }
  0x69   : > { %368 = vperm.xlu1 %1143, %v1316_v8   ;;  %372 = vperm.xlu0 %1142, %v1313_v7  }
  0x6d   : > { %376 = vperm.xlu1 %1143, %v1324_v10   ;;  %380 = vperm.xlu0 %1142, %v1321_v9  }
  0x71   : > { %384 = vperm.xlu1 %1143, %v1332_v12   ;;  %388 = vperm.xlu0 %1142, %v1329_v11  }
  0x75   : > { %392 = vperm.xlu1 %1143, %v1340_v14   ;;  %396 = vperm.xlu0 %1142, %v1337_v13  }
  0x79   : > { %400 = vperm.xlu1 %1143, %v1348_v16   ;;  %404 = vperm.xlu0 %1142, %v1345_v15  }
  0x7d   : > { %408 = vperm.xlu1 %1143, %v1356_v18   ;;  %412 = vperm.xlu0 %1142, %v1353_v17  }
  0x81   : > { %416 = vperm.xlu1 %1143, %v1364_v20   ;;  %420 = vperm.xlu0 %1142, %v1361_v19  }
  0x85   : > { %424 = vperm.xlu1 %1143, %v1372_v22   ;;  %428 = vperm.xlu0 %1142, %v1369_v21  }
  0x89   : > { %432 = vperm.xlu1 %1143, %v1380_v24   ;;  %436 = vperm.xlu0 %1142, %v1377_v23  }
  0x8d   : > { %440 = vperm.xlu1 %1143, %v1388_v26   ;;  %444 = vperm.xlu0 %1142, %v1385_v25  }
  0x91   : > { %448 = vperm.xlu1 %1143, %v1396_v28   ;;  %452 = vperm.xlu0 %1142, %v1393_v27  }
  0x95   : > { %456 = vperm.xlu1 %1143, %v1404_v30   ;;  %460 = vperm.xlu0 %1142, %v1401_v29  }
  0x99   : > { %464 = vperm.xlu1 %1143, %v1412_v32   ;;  %468 = vperm.xlu0 %1142, %v1409_v31  }
  0x9b   : > { %v1448_v34 = vpop.permute.xlu1 %194  ;;  %v1450_v35 = vpop.permute.xlu0 %184 }
  0x9d   : > { %1144 = vset.pattern.permute.xlu1 %v1214_v36  ;;  %1145 = vset.pattern.permute.xlu0 %v1214_v36 }
  0x9e   : > { %507 = vperm.xlu1 %1144, %v1292_v2   ;;  %511 = vperm.xlu0 %1145, %v1300_v4  }
  0x9f   : > { %v1454_v37 = vpop.permute.xlu1 %199  ;;  %v1456_v38 = vpop.permute.xlu0 %189 }
  0xa2   : > { %515 = vperm.xlu1 %1144, %v1289_v1   ;;  %523 = vperm.xlu0 %1145, %v1308_v6  }
  0xa3   : > { %v1460_v39 = vpop.permute.xlu1 %209  ;;  %v1462_v40 = vpop.permute.xlu0 %204 }
  0xa6   : > { %519 = vperm.xlu1 %1144, %v1297_v3   ;;  %531 = vperm.xlu0 %1145, %v1316_v8  }
  0xa7   : > { %v1466_v41 = vpop.permute.xlu1 %219  ;;  %v1468_v42 = vpop.permute.xlu0 %214 }
  0xaa   : > { %527 = vperm.xlu1 %1144, %v1305_v5   ;;  %539 = vperm.xlu0 %1145, %v1324_v10  }
  0xab   : > { %v1472_v43 = vpop.permute.xlu1 %229  ;;  %v1474_v44 = vpop.permute.xlu0 %224 }
  0xae   : > { %535 = vperm.xlu1 %1144, %v1313_v7   ;;  %547 = vperm.xlu0 %1145, %v1332_v12  }
  0xaf   : > { %v1478_v45 = vpop.permute.xlu1 %239  ;;  %v1480_v46 = vpop.permute.xlu0 %234 }
  0xb2   : > { %543 = vperm.xlu1 %1144, %v1321_v9   ;;  %555 = vperm.xlu0 %1145, %v1340_v14  }
  0xb3   : > { %v1484_v47 = vpop.permute.xlu1 %249  ;;  %v1486_v48 = vpop.permute.xlu0 %244 }
  0xb6   : > { %551 = vperm.xlu1 %1144, %v1329_v11   ;;  %563 = vperm.xlu0 %1145, %v1348_v16  }
  0xb7   : > { %v1490_v49 = vpop.permute.xlu1 %259  ;;  %v1492_v50 = vpop.permute.xlu0 %254 }
  0xba   : > { %559 = vperm.xlu1 %1144, %v1337_v13   ;;  %571 = vperm.xlu0 %1145, %v1356_v18  }
  0xbb   : > { %v1496_v51 = vpop.permute.xlu1 %269  ;;  %v1498_v52 = vpop.permute.xlu0 %264 }
  0xbe   : > { %567 = vperm.xlu1 %1144, %v1345_v15   ;;  %579 = vperm.xlu0 %1145, %v1364_v20  }
  0xbf   : > { %v1502_v53 = vpop.permute.xlu1 %279  ;;  %v1504_v54 = vpop.permute.xlu0 %274 }
  0xc0   : > { %2199 = vst [vmem:[#allocation5_spill] sm:$0xff] %v1502_v53 }
  0xc2   : > { %575 = vperm.xlu1 %1144, %v1353_v17   ;;  %587 = vperm.xlu0 %1145, %v1372_v22  }
  0xc3   : > { %v1508_v55 = vpop.permute.xlu1 %289  ;;  %v1510_v56 = vpop.permute.xlu0 %284 }
  0xc4   : > { %2200 = vst [vmem:[#allocation6_spill] sm:$0xff] %v1508_v55 }
  0xc6   : > { %583 = vperm.xlu1 %1144, %v1361_v19   ;;  %595 = vperm.xlu0 %1145, %v1380_v24  }
  0xc7   : > { %v1514_v57 = vpop.permute.xlu1 %299  ;;  %v1516_v58 = vpop.permute.xlu0 %294 }
  0xc8   : > { %2201 = vst [vmem:[#allocation7_spill] sm:$0xff] %v1514_v57 }
  0xca   : > { %591 = vperm.xlu1 %1144, %v1369_v21   ;;  %603 = vperm.xlu0 %1145, %v1388_v26  }
  0xcb   : > { %v1520_v59 = vpop.permute.xlu1 %309  ;;  %v1522_v60 = vpop.permute.xlu0 %304 }
  0xcc   : > { %2202 = vst [vmem:[#allocation8_spill] sm:$0xff] %v1520_v59 }
  0xce   : > { %599 = vperm.xlu1 %1144, %v1377_v23   ;;  %611 = vperm.xlu0 %1145, %v1396_v28  }
  0xcf   : > { %v1526_v61 = vpop.permute.xlu1 %319  ;;  %v1528_v62 = vpop.permute.xlu0 %314 }
  0xd0   : > { %2203 = vst [vmem:[#allocation9_spill] sm:$0xff] %v1526_v61  ;;  %v1215_v61 = vmov 0  }
  0xd2   : > { %607 = vperm.xlu1 %1144, %v1385_v25   ;;  %619 = vperm.xlu0 %1145, %v1404_v30  }
  0xd3   : > { %v1532_v63 = vpop.permute.xlu1 %329  ;;  %v1534_v0 = vpop.permute.xlu0 %324 }
  0xd4   : > { %2204 = vst [vmem:[#allocation10_spill] sm:$0xff] %v1532_v63 }
  0xd6   : > { %615 = vperm.xlu1 %1144, %v1393_v27   ;;  %627 = vperm.xlu0 %1145, %v1412_v32  }
  0xd7   : > { %v1538_v33 = vpop.permute.xlu1 %339  ;;  %v1540_v36 = vpop.permute.xlu0 %334 }
  0xd8   : > { %2205 = vst [vmem:[#allocation11_spill] sm:$0xff] %v1538_v33 }
  0xda   : > { %623 = vperm.xlu1 %1144, %v1401_v29   ;;  %1146 = vset.pattern.permute.xlu0 %v1215_v61 }
  0xdb   : > { %670 = vperm.xlu0 %1146, %v1292_v2  }
  0xdc   : > { %v1544_v59 = vpop.permute.xlu1 %348  ;;  %v1546_v57 = vpop.permute.xlu0 %344 }
  0xde   : > { %631 = vperm.xlu1 %1144, %v1409_v31  }
  0xdf   : > { %682 = vperm.xlu0 %1146, %v1297_v3  }
  0xe0   : > { %v1550_v63 = vpop.permute.xlu1 %352  ;;  %v1552_v55 = vpop.permute.xlu0 %356 }
  0xe2   : > { %1147 = vset.pattern.permute.xlu1 %v1215_v61 }
  0xe3   : > { %674 = vperm.xlu1 %1147, %v1300_v4   ;;  %690 = vperm.xlu0 %1146, %v1305_v5  }
  0xe4   : > { %v1556_v33 = vpop.permute.xlu1 %360  ;;  %v1558_v2 = vpop.permute.xlu0 %364 }
  0xe7   : > { %678 = vperm.xlu1 %1147, %v1289_v1   ;;  %698 = vperm.xlu0 %1146, %v1313_v7  }
  0xe8   : > { %v1562_v53 = vpop.permute.xlu1 %368  ;;  %v1564_v3 = vpop.permute.xlu0 %372 }
  0xeb   : > { %686 = vperm.xlu1 %1147, %v1308_v6   ;;  %706 = vperm.xlu0 %1146, %v1321_v9  }
  0xec   : > { %v1568_v61 = vpop.permute.xlu1 %376  ;;  %v1570_v4 = vpop.permute.xlu0 %380 }
  0xef   : > { %694 = vperm.xlu1 %1147, %v1316_v8   ;;  %714 = vperm.xlu0 %1146, %v1329_v11  }
  0xf0   : > { %v1574_v5 = vpop.permute.xlu1 %384  ;;  %v1576_v1 = vpop.permute.xlu0 %388 }
  0xf3   : > { %702 = vperm.xlu1 %1147, %v1324_v10   ;;  %722 = vperm.xlu0 %1146, %v1337_v13  }
  0xf4   : > { %v1580_v7 = vpop.permute.xlu1 %392  ;;  %v1582_v6 = vpop.permute.xlu0 %396 }
  0xf7   : > { %710 = vperm.xlu1 %1147, %v1332_v12   ;;  %730 = vperm.xlu0 %1146, %v1345_v15  }
  0xf8   : > { %v1586_v9 = vpop.permute.xlu1 %400  ;;  %v1588_v8 = vpop.permute.xlu0 %404 }
  0xfb   : > { %718 = vperm.xlu1 %1147, %v1340_v14   ;;  %738 = vperm.xlu0 %1146, %v1353_v17  }
  0xfc   : > { %v1592_v11 = vpop.permute.xlu1 %408  ;;  %v1594_v10 = vpop.permute.xlu0 %412 }
  0xff   : > { %726 = vperm.xlu1 %1147, %v1348_v16   ;;  %746 = vperm.xlu0 %1146, %v1361_v19   ;;  %v180_v19 = vlaneseq }
 0x100   : > { %v1598_v13 = vpop.permute.xlu1 %416  ;;  %v1600_v12 = vpop.permute.xlu0 %420 }
 0x103   : > { %734 = vperm.xlu1 %1147, %v1356_v18   ;;  %754 = vperm.xlu0 %1146, %v1369_v21  }
 0x104   : > { %v1604_v15 = vpop.permute.xlu1 %424  ;;  %v1606_v14 = vpop.permute.xlu0 %428 }
 0x105   : > { %2206 = vst [vmem:[#allocation12_spill] sm:$0xff] %v1606_v14 }
 0x107   : > { %742 = vperm.xlu1 %1147, %v1364_v20   ;;  %762 = vperm.xlu0 %1146, %v1377_v23   ;;  %v1622_v20 = vand.u32 127, %v180_v19 }
 0x108   : > { %v1610_v17 = vpop.permute.xlu1 %432  ;;  %v1612_v16 = vpop.permute.xlu0 %436 }
 0x109   : > { %vm342_vm0 = vcmp.lt.s32.totalorder %v1622_v20, 96  ;;  %vm505_vm1 = vcmp.lt.s32.totalorder %v1622_v20, 64  ;;  %vm668_vm2 = vcmp.lt.s32.totalorder %v1622_v20, 32 }
 0x10b   : > { %750 = vperm.xlu1 %1147, %v1372_v22   ;;  %770 = vperm.xlu0 %1146, %v1385_v25  }
 0x10c   : > { %v1616_v18 = vpop.permute.xlu1 %440  ;;  %v1618_v21 = vpop.permute.xlu0 %444 }
 0x10f   : > { %758 = vperm.xlu1 %1147, %v1380_v24   ;;  %778 = vperm.xlu0 %1146, %v1393_v27  }
 0x110   : > { %v1624_v23 = vpop.permute.xlu1 %448  ;;  %v1626_v14 = vpop.permute.xlu0 %452 }
 0x113   : > { %766 = vperm.xlu1 %1147, %v1388_v26   ;;  %786 = vperm.xlu0 %1146, %v1401_v29   ;;  %v474_v29 = vsel %vm342_vm0, %v1544_v59, %v1456_v38 }
 0x114   : > { %v457_v22 = vpop.permute.xlu1 %456  ;;  %v1631_v25 = vpop.permute.xlu0 %460 }
 0x115   : > { %v1636_v24 = vsel %vm342_vm0, %v457_v22, %v1534_v0 }
 0x117   : > { %774 = vperm.xlu1 %1147, %v1396_v28   ;;  %794 = vperm.xlu0 %1146, %v1409_v31  }
 0x118   : > { %v465_v27 = vpop.permute.xlu1 %464  ;;  %v1640_v19 = vpop.permute.xlu0 %468 }
 0x119   : > { %v1645_v26 = vsel %vm342_vm0, %v465_v27, %v1540_v36  ;;  %v477_v36 = vsel %vm342_vm0, %v1556_v33, %v1462_v40  ;;  %v481_v33 = vsel %vm342_vm0, %v1568_v61, %v1474_v44  ;;  %v485_v44 = vsel %vm342_vm0, %v1580_v7, %v1486_v48 }
 0x11a   : > { %v489_v48 = vsel %vm342_vm0, %v1592_v11, %v1498_v52  ;;  %v493_v52 = vsel %vm342_vm0, %v1604_v15, %v1510_v56  ;;  %v497_v56 = vsel %vm342_vm0, %v1616_v18, %v1522_v60 }
 0x11b   : > { %782 = vperm.xlu1 %1147, %v1404_v30   ;;  %v475_v30 = vsel %vm342_vm0, %v1550_v63, %v1448_v34 }
 0x11d   : > { %v1653_v28 = vpop.permute.xlu1 %507  ;;  %v512_v31 = vpop.permute.xlu0 %511 }
 0x11e   : > { %v1657_v0 = vsel %vm505_vm1, %v512_v31, %v474_v29 }
 0x11f   : > { %790 = vperm.xlu1 %1147, %v1412_v32   ;;  %v479_v32 = vsel %vm342_vm0, %v1562_v53, %v1468_v42  ;;  %v483_v42 = vsel %vm342_vm0, %v1574_v5, %v1480_v46  ;;  %v487_v46 = vsel %vm342_vm0, %v1586_v9, %v1492_v50  ;;  %v491_v50 = vsel %vm342_vm0, %v1598_v13, %v1504_v54 }
 0x120   : > { %v495_v54 = vsel %vm342_vm0, %v1610_v17, %v1516_v58  ;;  %v499_v58 = vsel %vm342_vm0, %v1624_v23, %v1528_v62 }
 0x121   : > { %v516_v38 = vpop.permute.xlu1 %515  ;;  %v524_v59 = vpop.permute.xlu0 %523 }
 0x122   : > { %v1670_v22 = vsel %vm505_vm1, %v516_v38, %v475_v30  ;;  %v1674_v27 = vsel %vm505_vm1, %v524_v59, %v477_v36 }
 0x125   : > { %v520_v34 = vpop.permute.xlu1 %519  ;;  %v532_v63 = vpop.permute.xlu0 %531 }
 0x126   : > { %v1682_v40 = vsel %vm505_vm1, %v532_v63, %v479_v32 }
 0x129   : > { %v1688_v29 = vpop.permute.xlu1 %527  ;;  %v540_v31 = vpop.permute.xlu0 %539 }
 0x12a   : > { %v1692_v30 = vsel %vm505_vm1, %v540_v31, %v481_v33 }
 0x12d   : > { %v1698_v53 = vpop.permute.xlu1 %535  ;;  %v548_v36 = vpop.permute.xlu0 %547 }
 0x12e   : > { %v1702_v38 = vsel %vm505_vm1, %v548_v36, %v483_v42 }
 0x131   : > { %v1708_v61 = vpop.permute.xlu1 %543  ;;  %v556_v59 = vpop.permute.xlu0 %555 }
 0x132   : > { %v1712_v32 = vsel %vm505_vm1, %v556_v59, %v485_v44 }
 0x135   : > { %v1718_v5 = vpop.permute.xlu1 %551  ;;  %v564_v63 = vpop.permute.xlu0 %563 }
 0x136   : > { %v1722_v33 = vsel %vm505_vm1, %v564_v63, %v487_v46 }
 0x139   : > { %v1728_v7 = vpop.permute.xlu1 %559  ;;  %v572_v31 = vpop.permute.xlu0 %571 }
 0x13a   : > { %v1732_v42 = vsel %vm505_vm1, %v572_v31, %v489_v48 }
 0x13d   : > { %v1738_v9 = vpop.permute.xlu1 %567  ;;  %v580_v36 = vpop.permute.xlu0 %579 }
 0x13e   : > { %v1742_v44 = vsel %vm505_vm1, %v580_v36, %v491_v50 }
 0x141   : > { %v1748_v11 = vpop.permute.xlu1 %575  ;;  %v588_v59 = vpop.permute.xlu0 %587 }
 0x142   : > { %v1752_v46 = vsel %vm505_vm1, %v588_v59, %v493_v52 }
 0x145   : > { %v1758_v13 = vpop.permute.xlu1 %583  ;;  %v596_v63 = vpop.permute.xlu0 %595 }
 0x146   : > { %v1762_v48 = vsel %vm505_vm1, %v596_v63, %v495_v54  ;;  %v473_v63 = vsel %vm342_vm0, %v1546_v57, %v1450_v35 }
 0x149   : > { %v1768_v15 = vpop.permute.xlu1 %591  ;;  %v604_v31 = vpop.permute.xlu0 %603 }
 0x14a   : > { %v1772_v50 = vsel %vm505_vm1, %v604_v31, %v497_v56  ;;  %v636_v31 = vsel %vm505_vm1, %v1653_v28, %v473_v63 }
 0x14d   : > { %v1778_v17 = vpop.permute.xlu1 %599  ;;  %v612_v36 = vpop.permute.xlu0 %611 }
 0x14e   : > { %v1782_v52 = vsel %vm505_vm1, %v612_v36, %v499_v58  ;;  %v1816_v58 = vld [vmem:[%s2195_s1 + $0x1] ss:$0 sm:$0xff]  ;;  %v476_v36 = vsel %vm342_vm0, %v1552_v55, %v1454_v37  ;;  %v478_v55 = vsel %vm342_vm0, %v1558_v2, %v1460_v39 }
 0x14f   : > { %2207 = vst [vmem:[#allocation13_spill] sm:$0xff] %v1782_v52  ;;  %v639_v28 = vsel %vm505_vm1, %v520_v34, %v476_v36  ;;  %v641_v34 = vsel %vm505_vm1, %v1688_v29, %v478_v55 }
 0x151   : > { %v1784_v60 = vpop.permute.xlu1 %607  ;;  %v620_v18 = vpop.permute.xlu0 %619 }
 0x152   : > { %v1789_v59 = vsel %vm505_vm1, %v620_v18, %v1636_v24  ;;  %v1808_v24 = vld [vmem:[%s2195_s1] ss:$0 sm:$0xff] }
 0x153   : > { %2208 = vst [vmem:[#allocation14_spill] sm:$0xff] %v1789_v59 }
 0x155   : > { %v1791_v54 = vpop.permute.xlu1 %615  ;;  %v628_v62 = vpop.permute.xlu0 %627 }
 0x156   : > { %v1796_v23 = vsel %vm505_vm1, %v628_v62, %v1645_v26 }
 0x157   : > { %2209 = vst [vmem:[#allocation15_spill] sm:$0xff] %v1796_v23 }
 0x159   : > { %v1803_v56 = vpop.permute.xlu1 %623 }
 0x15a   : > { %v671_v26 = vpop.permute.xlu0 %670 }
 0x15b   : > { %v799_v35 = vsel %vm668_vm2, %v671_v26, %v636_v31  ;;  %v1836_v31 = vld [vmem:[%s2195_s1 + $0x2] ss:$0 sm:$0xff] }
 0x15c   : > { %v835_v57 = vmul.f32 %v1808_v24, %v799_v35 }
 0x15d   : > { %v1826_v18 = vpop.permute.xlu1 %631 }
 0x15e   : > { %v871_v62 = vadd.f32 %v1816_v58, %v835_v57  ;;  %v683_v63 = vpop.permute.xlu0 %682 }
 0x15f   : > { %v802_v26 = vsel %vm668_vm2, %v683_v63, %v639_v28 }
 0x160   : > { %v903_v23 = vmul.f32 %v871_v62, %v799_v35  ;;  %v838_v37 = vmul.f32 %v1808_v24, %v802_v26 }
 0x162   : > { %v939_v57 = vadd.f32 %v1836_v31, %v903_v23  ;;  %v874_v36 = vadd.f32 %v1816_v58, %v838_v37  ;;  %v675_v59 = vpop.permute.xlu1 %674  ;;  %v691_v52 = vpop.permute.xlu0 %690  ;;  %v480_v23 = vsel %vm342_vm0, %v1564_v3, %v1466_v41  ;;  %v482_v37 = vsel %vm342_vm0, %v1570_v4, %v1472_v43 }
 0x163   : > { %v800_v35 = vsel %vm668_vm2, %v675_v59, %v1657_v0  ;;  %v804_v28 = vsel %vm668_vm2, %v691_v52, %v641_v34  ;;  %v643_v0 = vsel %vm505_vm1, %v1698_v53, %v480_v23  ;;  %v645_v43 = vsel %vm505_vm1, %v1708_v61, %v482_v37 }
 0x164   : > { %971 = vst [vmem:[%s1855_s6] sm:$0xff] %v939_v57  ;;  %v906_v39 = vmul.f32 %v874_v36, %v802_v26  ;;  %v836_v2 = vmul.f32 %v1808_v24, %v800_v35  ;;  %v840_v29 = vmul.f32 %v1808_v24, %v804_v28 }
 0x166   : > { %v942_v52 = vadd.f32 %v1836_v31, %v906_v39  ;;  %v872_v59 = vadd.f32 %v1816_v58, %v836_v2  ;;  %v876_v62 = vadd.f32 %v1816_v58, %v840_v29  ;;  %v679_v63 = vpop.permute.xlu1 %678  ;;  %v699_v26 = vpop.permute.xlu0 %698 }
 0x167   : > { %v801_v41 = vsel %vm668_vm2, %v679_v63, %v1670_v22  ;;  %v806_v3 = vsel %vm668_vm2, %v699_v26, %v643_v0 }
 0x168   : > { %974 = vst [vmem:[%s1855_s6 + $0x18] sm:$0xff] %v942_v52  ;;  %v904_v53 = vmul.f32 %v872_v59, %v800_v35  ;;  %v908_v55 = vmul.f32 %v876_v62, %v804_v28  ;;  %v837_v34 = vmul.f32 %v1808_v24, %v801_v41  ;;  %v842_v57 = vmul.f32 %v1808_v24, %v806_v3 }
 0x169   : > { %v484_v35 = vsel %vm342_vm0, %v1576_v1, %v1478_v45 }
 0x16a   : > { %v940_v4 = vadd.f32 %v1836_v31, %v904_v53  ;;  %v944_v22 = vadd.f32 %v1836_v31, %v908_v55  ;;  %v873_v36 = vadd.f32 %v1816_v58, %v837_v34  ;;  %v878_v39 = vadd.f32 %v1816_v58, %v842_v57  ;;  %v687_v2 = vpop.permute.xlu1 %686  ;;  %v707_v29 = vpop.permute.xlu0 %706 }
 0x16b   : > { %v803_v28 = vsel %vm668_vm2, %v687_v2, %v1674_v27  ;;  %v808_v61 = vsel %vm668_vm2, %v707_v29, %v645_v43  ;;  %v647_v45 = vsel %vm505_vm1, %v1718_v5, %v484_v35 }
 0x16c   : > { %972 = vst [vmem:[%s1855_s6 + $0x8] sm:$0xff] %v940_v4  ;;  %976 = vst [vmem:[%s1855_s6 + $0x28] sm:$0xff] %v944_v22  ;;  %v905_v23 = vmul.f32 %v873_v36, %v801_v41  ;;  %v910_v0 = vmul.f32 %v878_v39, %v806_v3  ;;  %v839_v52 = vmul.f32 %v1808_v24, %v803_v28 }
 0x16d   : > { %v844_v59 = vmul.f32 %v1808_v24, %v808_v61  ;;  %v486_v41 = vsel %vm342_vm0, %v1582_v6, %v1484_v47  ;;  %v488_v39 = vsel %vm342_vm0, %v1588_v8, %v1490_v49 }
 0x16e   : > { %v941_v1 = vadd.f32 %v1836_v31, %v905_v23  ;;  %v946_v27 = vadd.f32 %v1836_v31, %v910_v0  ;;  %v875_v62 = vadd.f32 %v1816_v58, %v839_v52  ;;  %v695_v26 = vpop.permute.xlu1 %694  ;;  %v715_v37 = vpop.permute.xlu0 %714  ;;  %v649_v47 = vsel %vm505_vm1, %v1728_v7, %v486_v41 }
 0x16f   : > { %v880_v63 = vadd.f32 %v1816_v58, %v844_v59  ;;  %v805_v3 = vsel %vm668_vm2, %v695_v26, %v1682_v40  ;;  %v810_v5 = vsel %vm668_vm2, %v715_v37, %v647_v45  ;;  %v651_v49 = vsel %vm505_vm1, %v1738_v9, %v488_v39 }
 0x170   : > { %973 = vst [vmem:[%s1855_s6 + $0x10] sm:$0xff] %v941_v1  ;;  %978 = vst [vmem:[%s1855_s6 + $0x38] sm:$0xff] %v946_v27  ;;  %v907_v53 = vmul.f32 %v875_v62, %v803_v28  ;;  %v841_v34 = vmul.f32 %v1808_v24, %v805_v3  ;;  %v846_v57 = vmul.f32 %v1808_v24, %v810_v5 }
 0x171   : > { %v912_v55 = vmul.f32 %v880_v63, %v808_v61  ;;  %v490_v45 = vsel %vm342_vm0, %v1594_v10, %v1496_v51 }
 0x172   : > { %v943_v6 = vadd.f32 %v1836_v31, %v907_v53  ;;  %v877_v43 = vadd.f32 %v1816_v58, %v841_v34  ;;  %v882_v4 = vadd.f32 %v1816_v58, %v846_v57  ;;  %v703_v22 = vpop.permute.xlu1 %702  ;;  %v723_v36 = vpop.permute.xlu0 %722  ;;  %v653_v51 = vsel %vm505_vm1, %v1748_v11, %v490_v45  ;;  %v2210_v53 = vld [vmem:[#allocation5_spill] sm:$0xff] }
 0x173   : > { %v948_v40 = vadd.f32 %v1836_v31, %v912_v55  ;;  %v807_v2 = vsel %vm668_vm2, %v703_v22, %v1692_v30  ;;  %v812_v7 = vsel %vm668_vm2, %v723_v36, %v649_v47  ;;  %v492_v55 = vsel %vm342_vm0, %v1600_v12, %v2210_v53 }
 0x174   : > { %975 = vst [vmem:[%s1855_s6 + $0x20] sm:$0xff] %v943_v6  ;;  %v909_v29 = vmul.f32 %v877_v43, %v805_v3  ;;  %v914_v35 = vmul.f32 %v882_v4, %v810_v5  ;;  %v843_v28 = vmul.f32 %v1808_v24, %v807_v2  ;;  %v848_v61 = vmul.f32 %v1808_v24, %v812_v7 }
 0x175   : > { %980 = vst [vmem:[%s1855_s6 + $0x48] sm:$0xff] %v948_v40  ;;  %v655_v12 = vsel %vm505_vm1, %v1758_v13, %v492_v55 }
 0x176   : > { %v945_v8 = vadd.f32 %v1836_v31, %v909_v29  ;;  %v950_v30 = vadd.f32 %v1836_v31, %v914_v35  ;;  %v879_v23 = vadd.f32 %v1816_v58, %v843_v28  ;;  %v884_v0 = vadd.f32 %v1816_v58, %v848_v61  ;;  %v711_v52 = vpop.permute.xlu1 %710  ;;  %v731_v59 = vpop.permute.xlu0 %730 }
 0x177   : > { %v809_v1 = vsel %vm668_vm2, %v711_v52, %v1702_v38  ;;  %v814_v9 = vsel %vm668_vm2, %v731_v59, %v651_v49 }
 0x178   : > { %977 = vst [vmem:[%s1855_s6 + $0x30] sm:$0xff] %v945_v8  ;;  %982 = vst [vmem:[%s1855_s6 + $0x58] sm:$0xff] %v950_v30  ;;  %v911_v27 = vmul.f32 %v879_v23, %v807_v2  ;;  %v916_v62 = vmul.f32 %v884_v0, %v812_v7  ;;  %v845_v63 = vmul.f32 %v1808_v24, %v809_v1  ;;  %v2211_v2 = vld [vmem:[#allocation6_spill] sm:$0xff]  ;;  %v2212_v7 = vld [vmem:[#allocation12_spill] sm:$0xff] }
 0x179   : > { %v850_v26 = vmul.f32 %v1808_v24, %v814_v9  ;;  %v494_v29 = vsel %vm342_vm0, %v2212_v7, %v2211_v2 }
 0x17a   : > { %v947_v10 = vadd.f32 %v1836_v31, %v911_v27  ;;  %v952_v38 = vadd.f32 %v1836_v31, %v916_v62  ;;  %v881_v37 = vadd.f32 %v1816_v58, %v845_v63  ;;  %v719_v3 = vpop.permute.xlu1 %718  ;;  %v739_v5 = vpop.permute.xlu0 %738  ;;  %v657_v30 = vsel %vm505_vm1, %v1768_v15, %v494_v29 }
 0x17b   : > { %v886_v41 = vadd.f32 %v1816_v58, %v850_v26  ;;  %v811_v34 = vsel %vm668_vm2, %v719_v3, %v1712_v32  ;;  %v816_v11 = vsel %vm668_vm2, %v739_v5, %v653_v51  ;;  %v2214_v5 = vld [vmem:[#allocation8_spill] sm:$0xff] }
 0x17c   : > { %979 = vst [vmem:[%s1855_s6 + $0x40] sm:$0xff] %v947_v10  ;;  %984 = vst [vmem:[%s1855_s6 + $0x68] sm:$0xff] %v952_v38  ;;  %v913_v57 = vmul.f32 %v881_v37, %v809_v1  ;;  %v847_v6 = vmul.f32 %v1808_v24, %v811_v34  ;;  %v852_v40 = vmul.f32 %v1808_v24, %v816_v11  ;;  %v2213_v1 = vld [vmem:[#allocation7_spill] sm:$0xff] }
 0x17d   : > { %v918_v47 = vmul.f32 %v886_v41, %v814_v9  ;;  %v496_v9 = vsel %vm342_vm0, %v1612_v16, %v2213_v1  ;;  %v498_v53 = vsel %vm342_vm0, %v1618_v21, %v2214_v5 }
 0x17e   : > { %v949_v43 = vadd.f32 %v1836_v31, %v913_v57  ;;  %v883_v4 = vadd.f32 %v1816_v58, %v847_v6  ;;  %v888_v22 = vadd.f32 %v1816_v58, %v852_v40  ;;  %v727_v36 = vpop.permute.xlu1 %726  ;;  %v747_v39 = vpop.permute.xlu0 %746  ;;  %v659_v16 = vsel %vm505_vm1, %v1778_v17, %v496_v9 }
 0x17f   : > { %v954_v32 = vadd.f32 %v1836_v31, %v918_v47  ;;  %v813_v35 = vsel %vm668_vm2, %v727_v36, %v1722_v33  ;;  %v818_v13 = vsel %vm668_vm2, %v747_v39, %v655_v12  ;;  %v661_v21 = vsel %vm505_vm1, %v1784_v60, %v498_v53  ;;  %v2218_v53 = vld [vmem:[#allocation13_spill] sm:$0xff] }
 0x180   : > { %981 = vst [vmem:[%s1855_s6 + $0x50] sm:$0xff] %v949_v43  ;;  %v915_v28 = vmul.f32 %v883_v4, %v811_v34  ;;  %v920_v61 = vmul.f32 %v888_v22, %v816_v11  ;;  %v849_v49 = vmul.f32 %v1808_v24, %v813_v35  ;;  %v854_v8 = vmul.f32 %v1808_v24, %v818_v13  ;;  %v2215_v4 = vld [vmem:[#allocation9_spill] sm:$0xff] }
 0x181   : > { %986 = vst [vmem:[%s1855_s6 + $0x78] sm:$0xff] %v954_v32  ;;  %v500_v22 = vsel %vm342_vm0, %v1626_v14, %v2215_v4 }
 0x182   : > { %v951_v23 = vadd.f32 %v1836_v31, %v915_v28  ;;  %v956_v33 = vadd.f32 %v1836_v31, %v920_v61  ;;  %v885_v0 = vadd.f32 %v1816_v58, %v849_v49  ;;  %v890_v52 = vadd.f32 %v1816_v58, %v854_v8  ;;  %v735_v59 = vpop.permute.xlu1 %734  ;;  %v755_v45 = vpop.permute.xlu0 %754  ;;  %v2216_v8 = vld [vmem:[#allocation10_spill] sm:$0xff] }
 0x183   : > { %v815_v27 = vsel %vm668_vm2, %v735_v59, %v1732_v42  ;;  %v820_v15 = vsel %vm668_vm2, %v755_v45, %v657_v30  ;;  %v663_v14 = vsel %vm505_vm1, %v1791_v54, %v500_v22  ;;  %v502_v30 = vsel %vm342_vm0, %v1631_v25, %v2216_v8 }
 0x184   : > { %983 = vst [vmem:[%s1855_s6 + $0x60] sm:$0xff] %v951_v23  ;;  %988 = vst [vmem:[%s1855_s6 + $0x88] sm:$0xff] %v956_v33  ;;  %v917_v62 = vmul.f32 %v885_v0, %v813_v35  ;;  %v922_v63 = vmul.f32 %v890_v52, %v818_v13  ;;  %v851_v26 = vmul.f32 %v1808_v24, %v815_v27 }
 0x185   : > { %v856_v51 = vmul.f32 %v1808_v24, %v820_v15  ;;  %v665_v25 = vsel %vm505_vm1, %v1803_v56, %v502_v30 }
 0x186   : > { %v953_v10 = vadd.f32 %v1836_v31, %v917_v62  ;;  %v958_v42 = vadd.f32 %v1836_v31, %v922_v63  ;;  %v887_v38 = vadd.f32 %v1816_v58, %v851_v26  ;;  %v743_v41 = vpop.permute.xlu1 %742  ;;  %v763_v3 = vpop.permute.xlu0 %762  ;;  %v2217_v62 = vld [vmem:[#allocation11_spill] sm:$0xff] }
 0x187   : > { %v892_v37 = vadd.f32 %v1816_v58, %v856_v51  ;;  %v817_v55 = vsel %vm668_vm2, %v743_v41, %v1742_v44  ;;  %v822_v17 = vsel %vm668_vm2, %v763_v3, %v659_v16  ;;  %v504_v63 = vsel %vm342_vm0, %v1640_v19, %v2217_v62 }
 0x188   : > { %985 = vst [vmem:[%s1855_s6 + $0x70] sm:$0xff] %v953_v10  ;;  %990 = vst [vmem:[%s1855_s6 + $0x98] sm:$0xff] %v958_v42  ;;  %v919_v34 = vmul.f32 %v887_v38, %v815_v27  ;;  %v853_v57 = vmul.f32 %v1808_v24, %v817_v55  ;;  %v858_v47 = vmul.f32 %v1808_v24, %v822_v17 }
 0x189   : > { %v924_v11 = vmul.f32 %v892_v37, %v820_v15  ;;  %v667_v19 = vsel %vm505_vm1, %v1826_v18, %v504_v63 }
 0x18a   : > { %v955_v6 = vadd.f32 %v1836_v31, %v919_v34  ;;  %v889_v40 = vadd.f32 %v1816_v58, %v853_v57  ;;  %v894_v12 = vadd.f32 %v1816_v58, %v858_v47  ;;  %v751_v43 = vpop.permute.xlu1 %750  ;;  %v771_v32 = vpop.permute.xlu0 %770 }
 0x18b   : > { %v960_v44 = vadd.f32 %v1836_v31, %v924_v11  ;;  %v819_v36 = vsel %vm668_vm2, %v751_v43, %v1752_v46  ;;  %v824_v60 = vsel %vm668_vm2, %v771_v32, %v661_v21 }
 0x18c   : > { %987 = vst [vmem:[%s1855_s6 + $0x80] sm:$0xff] %v955_v6  ;;  %v921_v39 = vmul.f32 %v889_v40, %v817_v55  ;;  %v926_v2 = vmul.f32 %v894_v12, %v822_v17  ;;  %v855_v7 = vmul.f32 %v1808_v24, %v819_v36  ;;  %v860_v29 = vmul.f32 %v1808_v24, %v824_v60  ;;  %v2219_v12 = vld [vmem:[#allocation14_spill] sm:$0xff] }
 0x18d   : > { %992 = vst [vmem:[%s1855_s6 + $0xa8] sm:$0xff] %v960_v44 }
 0x18e   : > { %v957_v35 = vadd.f32 %v1836_v31, %v921_v39  ;;  %v962_v46 = vadd.f32 %v1836_v31, %v926_v2  ;;  %v891_v13 = vadd.f32 %v1816_v58, %v855_v7  ;;  %v896_v28 = vadd.f32 %v1816_v58, %v860_v29  ;;  %v759_v61 = vpop.permute.xlu1 %758  ;;  %v779_v49 = vpop.permute.xlu0 %778  ;;  %v2220_v7 = vld [vmem:[#allocation15_spill] sm:$0xff] }
 0x18f   : > { %v821_v23 = vsel %vm668_vm2, %v759_v61, %v1762_v48  ;;  %v826_v54 = vsel %vm668_vm2, %v779_v49, %v663_v14 }
 0x190   : > { %989 = vst [vmem:[%s1855_s6 + $0x90] sm:$0xff] %v957_v35  ;;  %994 = vst [vmem:[%s1855_s6 + $0xb8] sm:$0xff] %v962_v46  ;;  %v923_v33 = vmul.f32 %v891_v13, %v819_v36  ;;  %v928_v0 = vmul.f32 %v896_v28, %v824_v60  ;;  %v857_v52 = vmul.f32 %v1808_v24, %v821_v23 }
 0x191   : > { %v862_v59 = vmul.f32 %v1808_v24, %v826_v54 }
 0x192   : > { %v959_v45 = vadd.f32 %v1836_v31, %v923_v33  ;;  %v964_v48 = vadd.f32 %v1836_v31, %v928_v0  ;;  %v893_v1 = vadd.f32 %v1816_v58, %v857_v52  ;;  %v767_v27 = vpop.permute.xlu1 %766  ;;  %v787_v15 = vpop.permute.xlu0 %786 }
 0x193   : > { %v898_v9 = vadd.f32 %v1816_v58, %v862_v59  ;;  %v823_v26 = vsel %vm668_vm2, %v767_v27, %v1772_v50  ;;  %v828_v56 = vsel %vm668_vm2, %v787_v15, %v665_v25 }
 0x194   : > { %991 = vst [vmem:[%s1855_s6 + $0xa0] sm:$0xff] %v959_v45  ;;  %996 = vst [vmem:[%s1855_s6 + $0xc8] sm:$0xff] %v964_v48  ;;  %v925_v51 = vmul.f32 %v893_v1, %v821_v23  ;;  %v859_v10 = vmul.f32 %v1808_v24, %v823_v26  ;;  %v864_v42 = vmul.f32 %v1808_v24, %v828_v56 }
 0x195   : > { %v930_v16 = vmul.f32 %v898_v9, %v826_v54 }
 0x196   : > { %v961_v38 = vadd.f32 %v1836_v31, %v925_v51  ;;  %v895_v37 = vadd.f32 %v1816_v58, %v859_v10  ;;  %v900_v41 = vadd.f32 %v1816_v58, %v864_v42  ;;  %v775_v3 = vpop.permute.xlu1 %774  ;;  %v795_v5 = vpop.permute.xlu0 %794 }
 0x197   : > { %v966_v50 = vadd.f32 %v1836_v31, %v930_v16  ;;  %v825_v55 = vsel %vm668_vm2, %v775_v3, %v2218_v53  ;;  %v830_v17 = vsel %vm668_vm2, %v795_v5, %v667_v19 }
 0x198   : > { %993 = vst [vmem:[%s1855_s6 + $0xb0] sm:$0xff] %v961_v38  ;;  %v927_v18 = vmul.f32 %v895_v37, %v823_v26  ;;  %v932_v34 = vmul.f32 %v900_v41, %v828_v56  ;;  %v861_v11 = vmul.f32 %v1808_v24, %v825_v55  ;;  %v866_v57 = vmul.f32 %v1808_v24, %v830_v17 }
 0x199   : > { %998 = vst [vmem:[%s1855_s6 + $0xd8] sm:$0xff] %v966_v50 }
 0x19a   : > { %v963_v47 = vadd.f32 %v1836_v31, %v927_v18  ;;  %v968_v21 = vadd.f32 %v1836_v31, %v932_v34  ;;  %v897_v6 = vadd.f32 %v1816_v58, %v861_v11  ;;  %v902_v44 = vadd.f32 %v1816_v58, %v866_v57  ;;  %v783_v40 = vpop.permute.xlu1 %782 }
 0x19b   : > { %v827_v43 = vsel %vm668_vm2, %v783_v40, %v2219_v12 }
 0x19c   : > { %995 = vst [vmem:[%s1855_s6 + $0xc0] sm:$0xff] %v963_v47  ;;  %1000 = vst [vmem:[%s1855_s6 + $0xe8] sm:$0xff] %v968_v21  ;;  %v929_v32 = vmul.f32 %v897_v6, %v825_v55  ;;  %v934_v4 = vmul.f32 %v902_v44, %v830_v17  ;;  %v863_v22 = vmul.f32 %v1808_v24, %v827_v43 }
 0x19e   : > { %v965_v36 = vadd.f32 %v1836_v31, %v929_v32  ;;  %v970_v60 = vadd.f32 %v1836_v31, %v934_v4  ;;  %v899_v39 = vadd.f32 %v1816_v58, %v863_v22  ;;  %v791_v2 = vpop.permute.xlu1 %790 }
 0x19f   : > { %v829_v29 = vsel %vm668_vm2, %v791_v2, %v2220_v7 }
 0x1a0   : > { %997 = vst [vmem:[%s1855_s6 + $0xd0] sm:$0xff] %v965_v36  ;;  %1002 = vst [vmem:[%s1855_s6 + $0xf8] sm:$0xff] %v970_v60  ;;  %v931_v14 = vmul.f32 %v899_v39, %v827_v43  ;;  %v865_v35 = vmul.f32 %v1808_v24, %v829_v29 }
 0x1a2   : > { %v967_v46 = vadd.f32 %v1836_v31, %v931_v14  ;;  %v901_v13 = vadd.f32 %v1816_v58, %v865_v35 }
 0x1a4   : > { %999 = vst [vmem:[%s1855_s6 + $0xe0] sm:$0xff] %v967_v46  ;;  %v933_v28 = vmul.f32 %v901_v13, %v829_v29 }
 0x1a6   : > { %v969_v20 = vadd.f32 %v1836_v31, %v933_v28 }
 0x1a8   : > { %1001 = vst [vmem:[%s1855_s6 + $0xf0] sm:$0xff] %v969_v20 }
 0x1a9   : > { %1161 = shalt.err (!%p1158_p3)
}
 0x1aa   : > { %s1162_s25 = scalar_lea.hbm %s2145_s17, 4096  ;;  %s1166_s28 = scalar_lea.hbm %s2196_s2, 8192 }
 0x1ab   : > { %p1163_p4 = scmp.ne.s32.totalorder %s2145_s17, %s1162_s25  ;;  %p1167_p9 = scmp.lt.u32.totalorder %s2145_s17, %s2196_s2 }
 0x1ac   : > { %p1168_p10 = scmp.lt.u32.totalorder %s1166_s28, %s1162_s25  ;;  %p1170_p12 = scmp.lt.u32.totalorder %s1162_s25, %s2145_s17 }
 0x1ad   : > { %p1164_p7 = pnand %p1163_p4, %p1272_p5 }
 0x1ae   : > { %p1169_p11 = por %p1168_p10, %p1167_p9 }
 0x1af   : > { %p1165_p8 = pneg %p1164_p7 }
 0x1b0   : > { %p1171_p13 = por %p1170_p12, %p1169_p11 }
 0x1b2   : > { %p1172_p0 = pnand %p1171_p13, %p1165_p8 }
 0x1b4   : > { %1175 = shalt.err (!%p1172_p0)
}
 0x1b5   : > { %s1217_s3 = smov 128   ;;  %s1218_s4 = smov 8  }
 0x1b6   : > { %1095 = dma.vmem_to_hbm [thread:$0]  (%p1272_p5), %s2147_s8, 4096, %s2145_s17, %s2153_s21, %s1217_s3, %s1217_s3, %s1218_s4  }
 0x1b7 PF: > { %p1101_p1 = scmp.ge.s32.totalorder %s1210_s12, 2  ;;  %s1032_s5 = sand.u32 1, %s1198_s9  }
 0x1b8   : > { %s1033_s6 = scalar_lea.sflag [#allocation3], %s1032_s5 }
 0x1b9   : > { %p1098_p2 = pnand %p1101_p1, %p1276_p6 }
 0x1bb   : > { %1193 = dma.done.wait (!%p1098_p2), %s1033_s6, 4096  }
 0x1bc   : > { %1195 = vsyncadd (!%p1098_p2), %s1033_s6, 4294963200  ;;  %p12_p3 = scmp.ge.s32.totalorder %s1259_s15, 4   ;;  %s2221_s9 = smov %s1202_s10 }
 0x1bd   : > { %s2222_s10 = smov %s1206_s11  ;;  %s2223_s11 = smov %s1270_s18 }
 0x1be   : > { %s2224_s12 = smov %s1259_s15  ;;  %14 = sbr.rel (!%p12_p3) target bundleno = 3 (0x3), region = 63 }
 0x1c5   :  { %1038 = vsyncpa [#allocation3], 1 }
 0x1c6   :  { %1040 = vsyncpa [#allocation3 + $0x1], 1 }

</bundles_post_ra>
